<compile_context>
chip_gen: v7x
topology: tpu7x:2x2x1
jax: 0.10.0
libtpu: 0.0.40
codegen_flags: <defaults>
</compile_context>

<pallas_src>
import functools

import jax
import jax.numpy as jnp
from jax.experimental import pallas as pl
from jax.experimental.pallas import tpu as pltpu


# --------------------------------------------------------------------------
# Pallas kernel (one grid step == one example)
# --------------------------------------------------------------------------
def _turn_switch_kernel(
    sep_ids_ref,   # SMEM (N, T_pad) int32  -- scalar-prefetched sep positions
    emb_ref,       # VMEM (S, D)      f32   -- this example's token embeddings
    mask_ref,      # VMEM (T_pad, 1)  f32   -- turn mask (0 on padded rows)
    label_ref,     # VMEM (T_pad, Vp) f32   -- multi-hot labels (0 on padding)
    w1_ref,        # VMEM (4D, H)     f32
    b1_ref,        # VMEM (1, H)      f32
    w2_ref,        # VMEM (H, Vp)     f32   -- zero-padded vocab columns
    b2_ref,        # VMEM (1, Vp)     f32
    comp_ref,      # out  (T_pad, 4D) f32   -- comprehensive embedding
    probs_ref,     # out  (T_pad, Vp) f32   -- sigmoid probs; loss in [0,Vp-1]
    sep_buf,       # scratch VMEM (T_pad, D)
    pre_buf,       # scratch VMEM (T_pad, D)
    *,
    leaky_rate: float,
    loss_scalar: float,
    valid_v: int,
):
    n = pl.program_id(0)
    t_pad, d = sep_buf.shape

    # ---- fused index_select: gather sep rows + previous-turn rows ---------
    # pre[t] = emb[sep_id[t-1]] for t >= 1, pre[0] = 0  (matches the torch
    # cat([0], sep_id[:-1]) followed by pre[:, 0, :] = 0).
    pre_buf[pl.ds(0, 1), :] = jnp.zeros((1, d), jnp.float32)
    for t in range(t_pad):                       # tiny static unroll (T_pad=8)
        sid = sep_ids_ref[n, t]                  # scalar read from SMEM
        row = emb_ref[pl.ds(sid, 1), :]          # dynamic row gather (1, D)
        sep_buf[pl.ds(t, 1), :] = row
        if t + 1 < t_pad:
            pre_buf[pl.ds(t + 1, 1), :] = row    # reuse the same loaded row

    sep = sep_buf[...]                           # (T_pad, D)
    pre = pre_buf[...]                           # (T_pad, D)

    diff = sep - pre
    pw = sep * pre
    comp = jnp.concatenate([sep, pre, diff, pw], axis=-1)   # (T_pad, 4D)
    comp_ref[...] = comp

    # ---- classification MLP: Linear -> LeakyReLU -> Linear -> Sigmoid -----
    h = jnp.dot(comp, w1_ref[...], preferred_element_type=jnp.float32)
    h = h + b1_ref[...]
    h = jnp.where(h > 0, h, leaky_rate * h)                 # LeakyReLU

    z = jnp.dot(h, w2_ref[...], preferred_element_type=jnp.float32)
    z = z + b2_ref[...]
    probs = jax.nn.sigmoid(z)                               # (T_pad, Vp)

    # ---- masked BCE mean over selected rows x real vocab lanes ------------
    label = label_ref[...]
    row_valid = (mask_ref[...] > 0).astype(jnp.float32)     # (T_pad, 1)
    col = jax.lax.broadcasted_iota(jnp.int32, probs.shape, 1)
    lane_valid = (col < valid_v).astype(jnp.float32)        # exclude padding
    valid = row_valid * lane_valid

    eps = 1e-4
    pc = jnp.clip(probs, eps, 1.0 - eps)                    # clamp probs only
    bce = -(label * jnp.log(pc) + (1.0 - label) * jnp.log(1.0 - pc))

    masked_sum = jnp.sum(bce * valid)
    count = jnp.sum(row_valid) * jnp.float32(valid_v)
    loss = jnp.where(count > 0,
                     masked_sum / jnp.maximum(count, 1.0) * loss_scalar,
                     jnp.float32(0.0))

    # Fold the per-example scalar loss into a spare padded lane of the
    # lane-dense probs output (avoids a dedicated tiny output DMA).
    rid = jax.lax.broadcasted_iota(jnp.int32, probs.shape, 0)
    vp = probs.shape[-1]
    probs_ref[...] = jnp.where((rid == 0) & (col == vp - 1), loss, probs)


# --------------------------------------------------------------------------
# Wrapper: padding, param packing, pallas_call, output unpadding
# --------------------------------------------------------------------------
def turn_switch_forward(embedded_text_input, sep_id, mask, label, params,
                        leaky_rate=0.2, loss_scalar=4.0):
    """Batched forward.

    embedded_text_input: (N, S, D) f32   (the torch module's batch-of-1 axis
                                          becomes the example axis N here)
    sep_id: (N, T) int   mask: (N, T)    label: (N, T, V)
    Returns a dict mirroring the torch module output (batched over N).
    """
    w1 = params["w1"].astype(jnp.float32)
    b1 = params["b1"].astype(jnp.float32)
    w2 = params["w2"].astype(jnp.float32)
    b2 = params["b2"].astype(jnp.float32)

    emb = jnp.asarray(embedded_text_input, jnp.float32)
    N, S, D = emb.shape
    T = sep_id.shape[-1]
    H = w1.shape[-1]
    V = w2.shape[-1]

    T_pad = pl.cdiv(T, 8) * 8                    # sublane-quantum rows
    V_pad = pl.cdiv(V + 1, 128) * 128            # lane-dense vocab (+1 spare
                                                 #  lane to stash the loss)

    sep_p = jnp.pad(sep_id.astype(jnp.int32), ((0, 0), (0, T_pad - T)))
    mask_p = jnp.pad(mask.astype(jnp.float32),
                     ((0, 0), (0, T_pad - T))).reshape(N, T_pad, 1)
    label_p = jnp.pad(label.astype(jnp.float32),
                      ((0, 0), (0, T_pad - T), (0, V_pad - V)))
    w2_p = jnp.pad(w2, ((0, 0), (0, V_pad - V)))
    b2_p = jnp.pad(b2.reshape(1, -1), ((0, 0), (0, V_pad - V)))
    b1_2d = b1.reshape(1, -1)

    kernel = functools.partial(_turn_switch_kernel,
                               leaky_rate=float(leaky_rate),
                               loss_scalar=float(loss_scalar),
                               valid_v=V)

    grid_spec = pltpu.PrefetchScalarGridSpec(
        num_scalar_prefetch=1,                   # sep_p lives in SMEM
        grid=(N,),
        in_specs=[
            pl.BlockSpec((None, S, D), lambda n, sep: (n, 0, 0)),        # emb
            pl.BlockSpec((None, T_pad, 1), lambda n, sep: (n, 0, 0)),    # mask
            pl.BlockSpec((None, T_pad, V_pad), lambda n, sep: (n, 0, 0)),  # label
            pl.BlockSpec((4 * D, H), lambda n, sep: (0, 0)),             # w1
            pl.BlockSpec((1, H), lambda n, sep: (0, 0)),                 # b1
            pl.BlockSpec((H, V_pad), lambda n, sep: (0, 0)),             # w2
            pl.BlockSpec((1, V_pad), lambda n, sep: (0, 0)),             # b2
        ],
        out_specs=[
            pl.BlockSpec((None, T_pad, 4 * D), lambda n, sep: (n, 0, 0)),
            pl.BlockSpec((None, T_pad, V_pad), lambda n, sep: (n, 0, 0)),
        ],
        scratch_shapes=[
            pltpu.VMEM((T_pad, D), jnp.float32),   # gathered sep rows
            pltpu.VMEM((T_pad, D), jnp.float32),   # gathered previous rows
        ],
    )

    comp_full, probs_full = pl.pallas_call(
        kernel,
        grid_spec=grid_spec,
        out_shape=(
            jax.ShapeDtypeStruct((N, T_pad, 4 * D), jnp.float32),
            jax.ShapeDtypeStruct((N, T_pad, V_pad), jnp.float32),
        ),
        compiler_params=pltpu.CompilerParams(
            dimension_semantics=("parallel",)),    # shards examples on v7x
    )(sep_p, emb, mask_p, label_p, w1, b1_2d, w2_p, b2_p)

    comp = comp_full[:, :T, :]
    probs = probs_full[:, :T, :V]
    loss = probs_full[:, 0, V_pad - 1]             # stashed per-example loss

    return {
        "comprehensive_sep_embed": comp,           # (N, T, 4D)
        "turn_sep_mask": mask,
        "diff_embed": comp[..., 2 * D:3 * D],
        "pointwise_embed": comp[..., 3 * D:],
        "logits": probs,                           # (N, T, V)
        "loss": loss,                              # (N,)
    }


# --------------------------------------------------------------------------
# Pure-JAX per-example reference (for correctness check)
# --------------------------------------------------------------------------
def _reference(embedded_text_input, sep_id, mask, label, params,
               leaky_rate=0.2, loss_scalar=4.0):
    emb = embedded_text_input[0]
    sep_sel = emb[sep_id, :]
    pre_sep_id = jnp.concatenate(
        [jnp.zeros((1,), dtype=sep_id.dtype), sep_id[:-1]], axis=0)
    pre_sel = emb[pre_sep_id, :].at[0].set(0.0)
    diff = sep_sel - pre_sel
    pw = sep_sel * pre_sel
    comp = jnp.concatenate([sep_sel, pre_sel, diff, pw], axis=-1)
    h = comp @ params["w1"] + params["b1"]
    h = jnp.where(h > 0, h, leaky_rate * h)
    p = jax.nn.sigmoid(h @ params["w2"] + params["b2"])
    maskf = (mask > 0).astype(jnp.float32)[:, None]
    pc = jnp.clip(p, 1e-4, 1 - 1e-4)
    bce = -(label * jnp.log(pc) + (1 - label) * jnp.log(1 - pc))
    cnt = jnp.sum(maskf) * p.shape[-1]
    loss = jnp.where(cnt > 0, jnp.sum(bce * maskf) / cnt * loss_scalar, 0.0)
    return comp, p, loss


# --------------------------------------------------------------------------
# Main
# --------------------------------------------------------------------------
if __name__ == "__main__":
    # Small, module-consistent shapes; N=2 examples batched into one call.
    N, S, D = 2, 16, 32           # examples, seq len, input_dim
    H = 32                        # hidden_dim
    V = 16                        # switch_label_size (len(vocab))
    T = 6                         # max_turn_len

    key = jax.random.PRNGKey(0)
    k_emb, k_w1, k_b1, k_w2, k_b2, k_lab = jax.random.split(key, 6)

    embedded_text_input = jax.random.normal(k_emb, (N, S, D), dtype=jnp.float32)
    sep_id = jnp.array([[2, 5, 7, 10, 12, 15],
                        [1, 4, 6, 9, 11, 14]], dtype=jnp.int32)          # (N, T)
    mask = jnp.array([[0.0, 1.0, 1.0, 1.0, 0.0, 0.0],
                      [0.0, 1.0, 1.0, 0.0, 1.0, 1.0]], dtype=jnp.float32)
    label = (jax.random.uniform(k_lab, (N, T, V)) > 0.5).astype(jnp.float32)

    # Deterministic Linear params (PyTorch-style uniform init bounds).
    lim1 = 1.0 / jnp.sqrt(4.0 * D)
    lim2 = 1.0 / jnp.sqrt(1.0 * H)
    params = {
        "w1": jax.random.uniform(k_w1, (4 * D, H), minval=-lim1, maxval=lim1,
                                 dtype=jnp.float32),
        "b1": jax.random.uniform(k_b1, (H,), minval=-lim1, maxval=lim1,
                                 dtype=jnp.float32),
        "w2": jax.random.uniform(k_w2, (H, V), minval=-lim2, maxval=lim2,
                                 dtype=jnp.float32),
        "b2": jax.random.uniform(k_b2, (V,), minval=-lim2, maxval=lim2,
                                 dtype=jnp.float32),
    }

    out = turn_switch_forward(embedded_text_input, sep_id, mask, label, params)
    jax.block_until_ready(out["loss"])

    import numpy as np
    for n in range(N):
        ref_comp, ref_p, ref_loss = _reference(
            embedded_text_input[n:n + 1], sep_id[n], mask[n], label[n], params)
        assert np.allclose(np.asarray(out["comprehensive_sep_embed"][n]),
                           np.asarray(ref_comp), atol=1e-5)
        assert np.allclose(np.asarray(out["logits"][n]),
                           np.asarray(ref_p), atol=1e-5)
        assert np.allclose(float(out["loss"][n]), float(ref_loss), atol=1e-5)

    print("KERNEL_OK")
</pallas_src>

<mosaic_0001>
module attributes {stable_mosaic.version = 11 : i64} {
  func.func @_turn_switch_kernel(%arg0: i32, %arg1: memref<2x8xi32, #tpu.memory_space<smem>>, %arg2: memref<1x16x32xf32, #tpu.memory_space<vmem>>, %arg3: memref<1x8x1xf32, #tpu.memory_space<vmem>>, %arg4: memref<1x8x128xf32, #tpu.memory_space<vmem>>, %arg5: memref<128x32xf32, #tpu.memory_space<vmem>>, %arg6: memref<1x32xf32, #tpu.memory_space<vmem>>, %arg7: memref<32x128xf32, #tpu.memory_space<vmem>>, %arg8: memref<1x128xf32, #tpu.memory_space<vmem>>, %arg9: memref<1x8x128xf32, #tpu.memory_space<vmem>>, %arg10: memref<1x8x128xf32, #tpu.memory_space<vmem>>, %arg11: memref<8x32xf32, #tpu.memory_space<vmem>>, %arg12: memref<8x32xf32, #tpu.memory_space<vmem>>) attributes {dimension_semantics = [#tpu.dimension_semantics<parallel>], iteration_bounds = array<i64: 2>, scalar_prefetch = 1 : i64, scratch_operands = 2 : i64, tpu.core_type = #tpu.core_type<tc>, window_params = [{transform_indices = @transform_0, window_bounds = array<i64: 1, 16, 32>}, {transform_indices = @transform_1, window_bounds = array<i64: 1, 8, 1>}, {transform_indices = @transform_2, window_bounds = array<i64: 1, 8, 128>}, {pipeline_mode = #tpu.pipeline_mode<synchronous>, transform_indices = @transform_3, window_bounds = array<i64: 128, 32>}, {pipeline_mode = #tpu.pipeline_mode<synchronous>, transform_indices = @transform_4, window_bounds = array<i64: 1, 32>}, {pipeline_mode = #tpu.pipeline_mode<synchronous>, transform_indices = @transform_5, window_bounds = array<i64: 32, 128>}, {pipeline_mode = #tpu.pipeline_mode<synchronous>, transform_indices = @transform_6, window_bounds = array<i64: 1, 128>}, {transform_indices = @transform_7, window_bounds = array<i64: 1, 8, 128>}, {transform_indices = @transform_8, window_bounds = array<i64: 1, 8, 128>}]} {
    %cst = arith.constant 0.000000e+00 : f32
    %0 = vector.broadcast %cst : f32 to vector<1x32xf32>
    %c0 = arith.constant 0 : index
    %c0_0 = arith.constant 0 : index
    %1 = vector.load %arg12[%c0, %c0_0] : memref<8x32xf32, #tpu.memory_space<vmem>>, vector<1x32xf32>
    tpu.vector_store %arg12[%c0, %c0_0], %0 {strides = array<i32>} : memref<8x32xf32, #tpu.memory_space<vmem>>, vector<1x32xf32>,
    %2 = arith.index_cast %arg0 : i32 to index
    %c0_1 = arith.constant 0 : index
    %3 = memref.load %arg1[%2, %c0_1] : memref<2x8xi32, #tpu.memory_space<smem>>
    %c0_2 = arith.constant 0 : index
    %4 = arith.index_cast %3 : i32 to index
    %c0_3 = arith.constant 0 : index
    %5 = vector.load %arg2[%c0_2, %4, %c0_3] : memref<1x16x32xf32, #tpu.memory_space<vmem>>, vector<1x1x32xf32>
    %6 = vector.shape_cast %5 : vector<1x1x32xf32> to vector<1x32xf32>
    %c0_4 = arith.constant 0 : index
    %c0_5 = arith.constant 0 : index
    %7 = vector.load %arg11[%c0_4, %c0_5] : memref<8x32xf32, #tpu.memory_space<vmem>>, vector<1x32xf32>
    tpu.vector_store %arg11[%c0_4, %c0_5], %6 {strides = array<i32>} : memref<8x32xf32, #tpu.memory_space<vmem>>, vector<1x32xf32>,
    %c1 = arith.constant 1 : index
    %c0_6 = arith.constant 0 : index
    %8 = vector.load %arg12[%c1, %c0_6] : memref<8x32xf32, #tpu.memory_space<vmem>>, vector<1x32xf32>
    tpu.vector_store %arg12[%c1, %c0_6], %6 {strides = array<i32>} : memref<8x32xf32, #tpu.memory_space<vmem>>, vector<1x32xf32>,
    %9 = arith.index_cast %arg0 : i32 to index
    %c1_7 = arith.constant 1 : index
    %10 = memref.load %arg1[%9, %c1_7] : memref<2x8xi32, #tpu.memory_space<smem>>
    %c0_8 = arith.constant 0 : index
    %11 = arith.index_cast %10 : i32 to index
    %c0_9 = arith.constant 0 : index
    %12 = vector.load %arg2[%c0_8, %11, %c0_9] : memref<1x16x32xf32, #tpu.memory_space<vmem>>, vector<1x1x32xf32>
    %13 = vector.shape_cast %12 : vector<1x1x32xf32> to vector<1x32xf32>
    %c1_10 = arith.constant 1 : index
    %c0_11 = arith.constant 0 : index
    %14 = vector.load %arg11[%c1_10, %c0_11] : memref<8x32xf32, #tpu.memory_space<vmem>>, vector<1x32xf32>
    tpu.vector_store %arg11[%c1_10, %c0_11], %13 {strides = array<i32>} : memref<8x32xf32, #tpu.memory_space<vmem>>, vector<1x32xf32>,
    %c2 = arith.constant 2 : index
    %c0_12 = arith.constant 0 : index
    %15 = vector.load %arg12[%c2, %c0_12] : memref<8x32xf32, #tpu.memory_space<vmem>>, vector<1x32xf32>
    tpu.vector_store %arg12[%c2, %c0_12], %13 {strides = array<i32>} : memref<8x32xf32, #tpu.memory_space<vmem>>, vector<1x32xf32>,
    %16 = arith.index_cast %arg0 : i32 to index
    %c2_13 = arith.constant 2 : index
    %17 = memref.load %arg1[%16, %c2_13] : memref<2x8xi32, #tpu.memory_space<smem>>
    %c0_14 = arith.constant 0 : index
    %18 = arith.index_cast %17 : i32 to index
    %c0_15 = arith.constant 0 : index
    %19 = vector.load %arg2[%c0_14, %18, %c0_15] : memref<1x16x32xf32, #tpu.memory_space<vmem>>, vector<1x1x32xf32>
    %20 = vector.shape_cast %19 : vector<1x1x32xf32> to vector<1x32xf32>
    %c2_16 = arith.constant 2 : index
    %c0_17 = arith.constant 0 : index
    %21 = vector.load %arg11[%c2_16, %c0_17] : memref<8x32xf32, #tpu.memory_space<vmem>>, vector<1x32xf32>
    tpu.vector_store %arg11[%c2_16, %c0_17], %20 {strides = array<i32>} : memref<8x32xf32, #tpu.memory_space<vmem>>, vector<1x32xf32>,
    %c3 = arith.constant 3 : index
    %c0_18 = arith.constant 0 : index
    %22 = vector.load %arg12[%c3, %c0_18] : memref<8x32xf32, #tpu.memory_space<vmem>>, vector<1x32xf32>
    tpu.vector_store %arg12[%c3, %c0_18], %20 {strides = array<i32>} : memref<8x32xf32, #tpu.memory_space<vmem>>, vector<1x32xf32>,
    %23 = arith.index_cast %arg0 : i32 to index
    %c3_19 = arith.constant 3 : index
    %24 = memref.load %arg1[%23, %c3_19] : memref<2x8xi32, #tpu.memory_space<smem>>
    %c0_20 = arith.constant 0 : index
    %25 = arith.index_cast %24 : i32 to index
    %c0_21 = arith.constant 0 : index
    %26 = vector.load %arg2[%c0_20, %25, %c0_21] : memref<1x16x32xf32, #tpu.memory_space<vmem>>, vector<1x1x32xf32>
    %27 = vector.shape_cast %26 : vector<1x1x32xf32> to vector<1x32xf32>
    %c3_22 = arith.constant 3 : index
    %c0_23 = arith.constant 0 : index
    %28 = vector.load %arg11[%c3_22, %c0_23] : memref<8x32xf32, #tpu.memory_space<vmem>>, vector<1x32xf32>
    tpu.vector_store %arg11[%c3_22, %c0_23], %27 {strides = array<i32>} : memref<8x32xf32, #tpu.memory_space<vmem>>, vector<1x32xf32>,
    %c4 = arith.constant 4 : index
    %c0_24 = arith.constant 0 : index
    %29 = vector.load %arg12[%c4, %c0_24] : memref<8x32xf32, #tpu.memory_space<vmem>>, vector<1x32xf32>
    tpu.vector_store %arg12[%c4, %c0_24], %27 {strides = array<i32>} : memref<8x32xf32, #tpu.memory_space<vmem>>, vector<1x32xf32>,
    %30 = arith.index_cast %arg0 : i32 to index
    %c4_25 = arith.constant 4 : index
    %31 = memref.load %arg1[%30, %c4_25] : memref<2x8xi32, #tpu.memory_space<smem>>
    %c0_26 = arith.constant 0 : index
    %32 = arith.index_cast %31 : i32 to index
    %c0_27 = arith.constant 0 : index
    %33 = vector.load %arg2[%c0_26, %32, %c0_27] : memref<1x16x32xf32, #tpu.memory_space<vmem>>, vector<1x1x32xf32>
    %34 = vector.shape_cast %33 : vector<1x1x32xf32> to vector<1x32xf32>
    %c4_28 = arith.constant 4 : index
    %c0_29 = arith.constant 0 : index
    %35 = vector.load %arg11[%c4_28, %c0_29] : memref<8x32xf32, #tpu.memory_space<vmem>>, vector<1x32xf32>
    tpu.vector_store %arg11[%c4_28, %c0_29], %34 {strides = array<i32>} : memref<8x32xf32, #tpu.memory_space<vmem>>, vector<1x32xf32>,
    %c5 = arith.constant 5 : index
    %c0_30 = arith.constant 0 : index
    %36 = vector.load %arg12[%c5, %c0_30] : memref<8x32xf32, #tpu.memory_space<vmem>>, vector<1x32xf32>
    tpu.vector_store %arg12[%c5, %c0_30], %34 {strides = array<i32>} : memref<8x32xf32, #tpu.memory_space<vmem>>, vector<1x32xf32>,
    %37 = arith.index_cast %arg0 : i32 to index
    %c5_31 = arith.constant 5 : index
    %38 = memref.load %arg1[%37, %c5_31] : memref<2x8xi32, #tpu.memory_space<smem>>
    %c0_32 = arith.constant 0 : index
    %39 = arith.index_cast %38 : i32 to index
    %c0_33 = arith.constant 0 : index
    %40 = vector.load %arg2[%c0_32, %39, %c0_33] : memref<1x16x32xf32, #tpu.memory_space<vmem>>, vector<1x1x32xf32>
    %41 = vector.shape_cast %40 : vector<1x1x32xf32> to vector<1x32xf32>
    %c5_34 = arith.constant 5 : index
    %c0_35 = arith.constant 0 : index
    %42 = vector.load %arg11[%c5_34, %c0_35] : memref<8x32xf32, #tpu.memory_space<vmem>>, vector<1x32xf32>
    tpu.vector_store %arg11[%c5_34, %c0_35], %41 {strides = array<i32>} : memref<8x32xf32, #tpu.memory_space<vmem>>, vector<1x32xf32>,
    %c6 = arith.constant 6 : index
    %c0_36 = arith.constant 0 : index
    %43 = vector.load %arg12[%c6, %c0_36] : memref<8x32xf32, #tpu.memory_space<vmem>>, vector<1x32xf32>
    tpu.vector_store %arg12[%c6, %c0_36], %41 {strides = array<i32>} : memref<8x32xf32, #tpu.memory_space<vmem>>, vector<1x32xf32>,
    %44 = arith.index_cast %arg0 : i32 to index
    %c6_37 = arith.constant 6 : index
    %45 = memref.load %arg1[%44, %c6_37] : memref<2x8xi32, #tpu.memory_space<smem>>
    %c0_38 = arith.constant 0 : index
    %46 = arith.index_cast %45 : i32 to index
    %c0_39 = arith.constant 0 : index
    %47 = vector.load %arg2[%c0_38, %46, %c0_39] : memref<1x16x32xf32, #tpu.memory_space<vmem>>, vector<1x1x32xf32>
    %48 = vector.shape_cast %47 : vector<1x1x32xf32> to vector<1x32xf32>
    %c6_40 = arith.constant 6 : index
    %c0_41 = arith.constant 0 : index
    %49 = vector.load %arg11[%c6_40, %c0_41] : memref<8x32xf32, #tpu.memory_space<vmem>>, vector<1x32xf32>
    tpu.vector_store %arg11[%c6_40, %c0_41], %48 {strides = array<i32>} : memref<8x32xf32, #tpu.memory_space<vmem>>, vector<1x32xf32>,
    %c7 = arith.constant 7 : index
    %c0_42 = arith.constant 0 : index
    %50 = vector.load %arg12[%c7, %c0_42] : memref<8x32xf32, #tpu.memory_space<vmem>>, vector<1x32xf32>
    tpu.vector_store %arg12[%c7, %c0_42], %48 {strides = array<i32>} : memref<8x32xf32, #tpu.memory_space<vmem>>, vector<1x32xf32>,
    %51 = arith.index_cast %arg0 : i32 to index
    %c7_43 = arith.constant 7 : index
    %52 = memref.load %arg1[%51, %c7_43] : memref<2x8xi32, #tpu.memory_space<smem>>
    %c0_44 = arith.constant 0 : index
    %53 = arith.index_cast %52 : i32 to index
    %c0_45 = arith.constant 0 : index
    %54 = vector.load %arg2[%c0_44, %53, %c0_45] : memref<1x16x32xf32, #tpu.memory_space<vmem>>, vector<1x1x32xf32>
    %55 = vector.shape_cast %54 : vector<1x1x32xf32> to vector<1x32xf32>
    %c7_46 = arith.constant 7 : index
    %c0_47 = arith.constant 0 : index
    %56 = vector.load %arg11[%c7_46, %c0_47] : memref<8x32xf32, #tpu.memory_space<vmem>>, vector<1x32xf32>
    tpu.vector_store %arg11[%c7_46, %c0_47], %55 {strides = array<i32>} : memref<8x32xf32, #tpu.memory_space<vmem>>, vector<1x32xf32>,
    %c0_48 = arith.constant 0 : index
    %c0_49 = arith.constant 0 : index
    %57 = vector.load %arg11[%c0_48, %c0_49] : memref<8x32xf32, #tpu.memory_space<vmem>>, vector<8x32xf32>
    %c0_50 = arith.constant 0 : index
    %c0_51 = arith.constant 0 : index
    %58 = vector.load %arg12[%c0_50, %c0_51] : memref<8x32xf32, #tpu.memory_space<vmem>>, vector<8x32xf32>
    %59 = arith.subf %57, %58 : vector<8x32xf32>
    %60 = arith.mulf %57, %58 : vector<8x32xf32>
    %61 = tpu.concatenate %57, %58, %59, %60 in 1 : vector<8x32xf32>, vector<8x32xf32>, vector<8x32xf32>, vector<8x32xf32> -> vector<8x128xf32>
    %c0_52 = arith.constant 0 : index
    %c0_53 = arith.constant 0 : index
    %c0_54 = arith.constant 0 : index
    %62 = vector.load %arg9[%c0_52, %c0_53, %c0_54] : memref<1x8x128xf32, #tpu.memory_space<vmem>>, vector<1x8x128xf32>
    %63 = vector.shape_cast %62 : vector<1x8x128xf32> to vector<8x128xf32>
    %64 = vector.shape_cast %61 : vector<8x128xf32> to vector<1x8x128xf32>
    tpu.vector_store %arg9[%c0_52, %c0_53, %c0_54], %64 {strides = array<i32>} : memref<1x8x128xf32, #tpu.memory_space<vmem>>, vector<1x8x128xf32>,
    %c0_55 = arith.constant 0 : index
    %c0_56 = arith.constant 0 : index
    %65 = vector.load %arg5[%c0_55, %c0_56] : memref<128x32xf32, #tpu.memory_space<vmem>>, vector<128x32xf32>
    %cst_57 = arith.constant dense<0.000000e+00> : vector<8x32xf32>
    %66 = tpu.matmul %61, %65, %cst_57 {dimension_numbers = #tpu.dot_dimension_numbers<[1], [0], [0], [1], [0, 0, 1, 1], [], []>} : vector<8x128xf32>, vector<128x32xf32>, vector<8x32xf32> -> vector<8x32xf32>
    %c0_58 = arith.constant 0 : index
    %c0_59 = arith.constant 0 : index
    %67 = vector.load %arg6[%c0_58, %c0_59] : memref<1x32xf32, #tpu.memory_space<vmem>>, vector<1x32xf32>
    %68 = vector.broadcast %67 : vector<1x32xf32> to vector<8x32xf32>
    %69 = arith.addf %66, %68 : vector<8x32xf32>
    %cst_60 = arith.constant 0.000000e+00 : f32
    %70 = vector.broadcast %cst_60 : f32 to vector<8x32xf32>
    %71 = arith.cmpf ogt, %69, %70 : vector<8x32xf32>
    %cst_61 = arith.constant 2.000000e-01 : f32
    %72 = vector.broadcast %cst_61 : f32 to vector<8x32xf32>
    %73 = arith.mulf %72, %69 : vector<8x32xf32>
    %74 = arith.select %71, %69, %73 : vector<8x32xi1>, vector<8x32xf32>
    %c0_62 = arith.constant 0 : index
    %c0_63 = arith.constant 0 : index
    %75 = vector.load %arg7[%c0_62, %c0_63] : memref<32x128xf32, #tpu.memory_space<vmem>>, vector<32x128xf32>
    %cst_64 = arith.constant dense<0.000000e+00> : vector<8x128xf32>
    %76 = tpu.matmul %74, %75, %cst_64 {dimension_numbers = #tpu.dot_dimension_numbers<[1], [0], [0], [1], [0, 0, 1, 1], [], []>} : vector<8x32xf32>, vector<32x128xf32>, vector<8x128xf32> -> vector<8x128xf32>
    %c0_65 = arith.constant 0 : index
    %c0_66 = arith.constant 0 : index
    %77 = vector.load %arg8[%c0_65, %c0_66] : memref<1x128xf32, #tpu.memory_space<vmem>>, vector<1x128xf32>
    %78 = vector.broadcast %77 : vector<1x128xf32> to vector<8x128xf32>
    %79 = arith.addf %76, %78 : vector<8x128xf32>
    %80 = arith.negf %79 : vector<8x128xf32>
    %81 = math.exp %80 : vector<8x128xf32>
    %cst_67 = arith.constant 1.000000e+00 : f32
    %82 = vector.broadcast %cst_67 : f32 to vector<8x128xf32>
    %83 = arith.addf %82, %81 : vector<8x128xf32>
    %84 = arith.divf %82, %83 : vector<8x128xf32>
    %c0_68 = arith.constant 0 : index
    %c0_69 = arith.constant 0 : index
    %c0_70 = arith.constant 0 : index
    %85 = vector.load %arg4[%c0_68, %c0_69, %c0_70] : memref<1x8x128xf32, #tpu.memory_space<vmem>>, vector<1x8x128xf32>
    %86 = vector.shape_cast %85 : vector<1x8x128xf32> to vector<8x128xf32>
    %c0_71 = arith.constant 0 : index
    %c0_72 = arith.constant 0 : index
    %c0_73 = arith.constant 0 : index
    %87 = vector.load %arg3[%c0_71, %c0_72, %c0_73] : memref<1x8x1xf32, #tpu.memory_space<vmem>>, vector<1x8x1xf32>
    %88 = vector.shape_cast %87 : vector<1x8x1xf32> to vector<8x1xf32>
    %cst_74 = arith.constant 0.000000e+00 : f32
    %89 = vector.broadcast %cst_74 : f32 to vector<8x1xf32>
    %90 = arith.cmpf ogt, %88, %89 : vector<8x1xf32>
    %91 = arith.extui %90 : vector<8x1xi1> to vector<8x1xi32>
    %92 = arith.sitofp %91 : vector<8x1xi32> to vector<8x1xf32>
    %93 = tpu.iota {dimensions = array<i32: 1>} : vector<8x128xi32>
    %c16_i32 = arith.constant 16 : i32
    %94 = vector.broadcast %c16_i32 : i32 to vector<8x128xi32>
    %95 = arith.cmpi slt, %93, %94 : vector<8x128xi32>
    %96 = arith.extui %95 : vector<8x128xi1> to vector<8x128xi32>
    %97 = arith.sitofp %96 : vector<8x128xi32> to vector<8x128xf32>
    %98 = vector.broadcast %92 : vector<8x1xf32> to vector<8x128xf32>
    %99 = arith.mulf %98, %97 : vector<8x128xf32>
    %cst_75 = arith.constant 9.99999974E-5 : f32
    %cst_76 = arith.constant 0.999899983 : f32
    %100 = vector.broadcast %cst_75 : f32 to vector<8x128xf32>
    %101 = arith.maximumf %100, %84 : vector<8x128xf32>
    %102 = vector.broadcast %cst_76 : f32 to vector<8x128xf32>
    %103 = arith.minimumf %102, %101 : vector<8x128xf32>
    %104 = math.log %103 : vector<8x128xf32>
    %105 = arith.mulf %86, %104 : vector<8x128xf32>
    %cst_77 = arith.constant 1.000000e+00 : f32
    %106 = vector.broadcast %cst_77 : f32 to vector<8x128xf32>
    %107 = arith.subf %106, %86 : vector<8x128xf32>
    %cst_78 = arith.constant 1.000000e+00 : f32
    %108 = vector.broadcast %cst_78 : f32 to vector<8x128xf32>
    %109 = arith.subf %108, %103 : vector<8x128xf32>
    %110 = math.log %109 : vector<8x128xf32>
    %111 = arith.mulf %107, %110 : vector<8x128xf32>
    %112 = arith.addf %105, %111 : vector<8x128xf32>
    %cst_79 = arith.constant 0.000000e+00 : f32
    %113 = vector.broadcast %cst_79 : f32 to vector<8x128xf32>
    %114 = arith.subf %113, %112 : vector<8x128xf32>
    %115 = arith.mulf %114, %99 : vector<8x128xf32>
    %116 = vector.shape_cast %115 : vector<8x128xf32> to vector<1x8x128xf32>
    %cst_80 = arith.constant dense<0.000000e+00> : vector<1xf32>
    %117 = vector.multi_reduction <add>, %116, %cst_80 [1, 2] : vector<1x8x128xf32> to vector<1xf32>
    %118 = vector.shape_cast %117 : vector<1xf32> to vector<1x1x1xf32>
    %119 = vector.extract %118[0, 0, 0] : f32 from vector<1x1x1xf32>
    %120 = vector.shape_cast %92 : vector<8x1xf32> to vector<1x8x1xf32>
    %cst_81 = arith.constant dense<0.000000e+00> : vector<1xf32>
    %121 = vector.multi_reduction <add>, %120, %cst_81 [1, 2] : vector<1x8x1xf32> to vector<1xf32>
    %122 = vector.shape_cast %121 : vector<1xf32> to vector<1x1x1xf32>
    %123 = vector.extract %122[0, 0, 0] : f32 from vector<1x1x1xf32>
    %cst_82 = arith.constant 1.600000e+01 : f32
    %124 = arith.mulf %123, %cst_82 : f32
    %cst_83 = arith.constant 0.000000e+00 : f32
    %125 = arith.cmpf ogt, %124, %cst_83 : f32
    %cst_84 = arith.constant 1.000000e+00 : f32
    %126 = arith.maximumf %124, %cst_84 : f32
    %127 = arith.divf %119, %126 : f32
    %cst_85 = arith.constant 4.000000e+00 : f32
    %128 = arith.mulf %127, %cst_85 : f32
    %cst_86 = arith.constant 0.000000e+00 : f32
    %129 = arith.select %125, %128, %cst_86 : f32
    %130 = tpu.iota {dimensions = array<i32: 0>} : vector<8x128xi32>
    %c0_i32 = arith.constant 0 : i32
    %131 = vector.broadcast %c0_i32 : i32 to vector<8x128xi32>
    %132 = arith.cmpi eq, %130, %131 : vector<8x128xi32>
    %c127_i32 = arith.constant 127 : i32
    %133 = vector.broadcast %c127_i32 : i32 to vector<8x128xi32>
    %134 = arith.cmpi eq, %93, %133 : vector<8x128xi32>
    %135 = arith.andi %132, %134 : vector<8x128xi1>
    %136 = vector.broadcast %129 : f32 to vector<8x128xf32>
    %137 = arith.select %135, %136, %84 : vector<8x128xi1>, vector<8x128xf32>
    %c0_87 = arith.constant 0 : index
    %c0_88 = arith.constant 0 : index
    %c0_89 = arith.constant 0 : index
    %138 = vector.load %arg10[%c0_87, %c0_88, %c0_89] : memref<1x8x128xf32, #tpu.memory_space<vmem>>, vector<1x8x128xf32>
    %139 = vector.shape_cast %138 : vector<1x8x128xf32> to vector<8x128xf32>
    %140 = vector.shape_cast %137 : vector<8x128xf32> to vector<1x8x128xf32>
    tpu.vector_store %arg10[%c0_87, %c0_88, %c0_89], %140 {strides = array<i32>} : memref<1x8x128xf32, #tpu.memory_space<vmem>>, vector<1x8x128xf32>,
    return
  }
  func.func @transform_0(%arg0: i32, %arg1: memref<2x8xi32, #tpu.memory_space<smem>>) -> (i32, i32, i32) {
    %c0_i32 = arith.constant 0 : i32
    %c0_i32_0 = arith.constant 0 : i32
    %c0_i32_1 = arith.constant 0 : i32
    return %arg0, %c0_i32, %c0_i32_0 : i32, i32, i32
  }
  func.func @transform_1(%arg0: i32, %arg1: memref<2x8xi32, #tpu.memory_space<smem>>) -> (i32, i32, i32) {
    %c0_i32 = arith.constant 0 : i32
    %c0_i32_0 = arith.constant 0 : i32
    %c0_i32_1 = arith.constant 0 : i32
    return %arg0, %c0_i32, %c0_i32_0 : i32, i32, i32
  }
  func.func @transform_2(%arg0: i32, %arg1: memref<2x8xi32, #tpu.memory_space<smem>>) -> (i32, i32, i32) {
    %c0_i32 = arith.constant 0 : i32
    %c0_i32_0 = arith.constant 0 : i32
    %c0_i32_1 = arith.constant 0 : i32
    return %arg0, %c0_i32, %c0_i32_0 : i32, i32, i32
  }
  func.func @transform_3(%arg0: i32, %arg1: memref<2x8xi32, #tpu.memory_space<smem>>) -> (i32, i32) {
    %c0_i32 = arith.constant 0 : i32
    %c0_i32_0 = arith.constant 0 : i32
    %c0_i32_1 = arith.constant 0 : i32
    return %c0_i32, %c0_i32_0 : i32, i32
  }
  func.func @transform_4(%arg0: i32, %arg1: memref<2x8xi32, #tpu.memory_space<smem>>) -> (i32, i32) {
    %c0_i32 = arith.constant 0 : i32
    %c0_i32_0 = arith.constant 0 : i32
    %c0_i32_1 = arith.constant 0 : i32
    return %c0_i32, %c0_i32_0 : i32, i32
  }
  func.func @transform_5(%arg0: i32, %arg1: memref<2x8xi32, #tpu.memory_space<smem>>) -> (i32, i32) {
    %c0_i32 = arith.constant 0 : i32
    %c0_i32_0 = arith.constant 0 : i32
    %c0_i32_1 = arith.constant 0 : i32
    return %c0_i32, %c0_i32_0 : i32, i32
  }
  func.func @transform_6(%arg0: i32, %arg1: memref<2x8xi32, #tpu.memory_space<smem>>) -> (i32, i32) {
    %c0_i32 = arith.constant 0 : i32
    %c0_i32_0 = arith.constant 0 : i32
    %c0_i32_1 = arith.constant 0 : i32
    return %c0_i32, %c0_i32_0 : i32, i32
  }
  func.func @transform_7(%arg0: i32, %arg1: memref<2x8xi32, #tpu.memory_space<smem>>) -> (i32, i32, i32) {
    %c0_i32 = arith.constant 0 : i32
    %c0_i32_0 = arith.constant 0 : i32
    %c0_i32_1 = arith.constant 0 : i32
    return %arg0, %c0_i32, %c0_i32_0 : i32, i32, i32
  }
  func.func @transform_8(%arg0: i32, %arg1: memref<2x8xi32, #tpu.memory_space<smem>>) -> (i32, i32, i32) {
    %c0_i32 = arith.constant 0 : i32
    %c0_i32_0 = arith.constant 0 : i32
    %c0_i32_1 = arith.constant 0 : i32
    return %arg0, %c0_i32, %c0_i32_0 : i32, i32, i32
  }
}

</mosaic_0001>

<bundles_post_ra>
// kernel: tpu_custom_call.1
= control target key start
LH: loop header
LB: loop body
LE: loop exit
PB: predicated region body
PF: predicated region fallthrough
CT: control target
= control target key end

     0   :  { %s1499_s0 = inlined_call_operand.vmem [shape: s32[2,8], index: 0, kind: input, shape index: {}]   ;;  %s1500_s1 = inlined_call_operand.vmem [shape: f32[2,16,32], index: 1, kind: input, shape index: {}]   ;;  %s1501_s2 = inlined_call_operand.vmem [shape: f32[2,8,1], index: 2, kind: input, shape index: {}]   ;;  %s1502_s3 = inlined_call_operand.vmem [shape: f32[2,8,128], index: 3, kind: input, shape index: {}]   ;;  %s1503_s4 = inlined_call_operand.vmem [shape: f32[128,32], index: 4, kind: input, shape index: {}]   ;;  %s1504_s5 = inlined_call_operand.vmem [shape: f32[1,32], index: 5, kind: input, shape index: {}]   ;;  %s1505_s6 = inlined_call_operand.vmem [shape: f32[32,128], index: 6, kind: input, shape index: {}]   ;;  %s1506_s7 = inlined_call_operand.vmem [shape: f32[1,128], index: 7, kind: input, shape index: {}]   ;;  %s1507_s8 = inlined_call_operand.hbm [shape: f32[2,8,128], index: 8, kind: output, shape index: {0}]   ;;  %s1508_s9 = inlined_call_operand.hbm [shape: f32[2,8,128], index: 9, kind: output, shape index: {1}]  }
   0x1   :  { %1510 = sst [smem:[#allocation15_spill]] %s1500_s1  ;;  %s15_s11 = sshll.u32 %s1499_s0, 4  ;;  %s16_s11 = int_to_ptr.vmem [resolvable:$true] %s15_s11 }
   0x2   :  { %s1028_s12 = scalar_lea.vmem %s16_s11, 32  ;;  %p1033_p1 = scmp.lt.s32.totalorder %s16_s11, %s16_s11 }
   0x3   :  { %p1029_p0 = scmp.ne.s32.totalorder %s16_s11, %s1028_s12  ;;  %p1034_p2 = scmp.lt.s32.totalorder %s1028_s12, %s1028_s12 }
   0x5   :  { %p1035_p3 = por %p1034_p2, %p1033_p1 }
   0x7   :  { %p1036_p4 = pnand %p1035_p3, %p1029_p0 }
   0x9   :  { %1039 = shalt.err (!%p1036_p4)  }
   0xa   :  { %s1138_s13 = smov [#allocation5]  }
   0xb   :  { %18 = dma.vmem_to_smem %s16_s11, 32, %s1138_s13, [#allocation4] }
   0xc   :  { %1112 = dma.done.wait [#allocation4], 32 }
   0xd   :  { %1113 = vsyncadd [#allocation4], 4294967264 }
   0xe   :  { %20 = sfence }
   0xf   :  { %21 = vsyncpa [#allocation7], 0 }
  0x10   :  { %23 = vsyncpa [#allocation7 + $0x1], 0 }
  0x11   :  { %24 = vsyncpa [#allocation9], 0 }
  0x12   :  { %26 = vsyncpa [#allocation9 + $0x1], 0  ;;  %s1202_s14 = smov 0   ;;  %s1204_s0 = smov 0  }
  0x13   :  { %s1206_s15 = smov 0   ;;  %s1208_s16 = smov 0  }
  0x14 LB: > { %1511 = sst [smem:[#allocation13_spill]] %s1132_s15  ;;  %s1223_s17 = sadd.s32 4294967295, %s1136_s16   ;;  %s1136_s16 = sphi %s1208_s16, %s1520_s16   ;;  %s1132_s15 = sphi %s1206_s15, %s1517_s15   ;;  %s1128_s0 = sphi %s1204_s0, %s1519_s0   ;;  %s1124_s14 = sphi %s1202_s14, %s1518_s14  }
  0x15   : > { %s835_s18 = sadd.s32 4294967294, %s1136_s16   ;;  %s1227_s19 = sadd.s32 1, %s1136_s16  }
  0x16   : > { %s201_s20 = sadd.s32 1, %s1132_s15  ;;  %s198_s21 = ssub.s32 %s1136_s16, %s1227_s19 }
  0x17   : > { %p211_p5 = scmp.ne.s32.totalorder %s1132_s15, %s1128_s0  ;;  %p199_p6 = scmp.eq.s32.totalorder %s198_s21, 0 }
  0x18   : > { %p212_p7 = scmp.eq.s32.totalorder %s1223_s17, 1  ;;  %p217_p8 = scmp.ne.s32.totalorder %s1128_s0, %s1124_s14 }
  0x19   : > { %p218_p9 = scmp.eq.s32.totalorder %s835_s18, 1  ;;  %p838_p12 = scmp.ge.s32.totalorder %s1136_s16, 1 }
  0x1a   : > { %s1238_s22 = scalar_select %p199_p6, %s1132_s15, %s201_s20  }
  0x1b   : > { %p1240_p10 = por %p212_p7, %p211_p5  ;;  %p1244_p11 = por %p218_p9, %p217_p8 }
  0x1c   : > { %1512 = sst [smem:[#allocation14_spill]] %s1238_s22  ;;  %p296_p13 = scmp.lt.s32.totalorder %s1136_s16, 3 }
  0x1e   : > { %p297_p0 = pnand %p838_p12, %p296_p13 }
  0x1f   : > { %p343_p1 = scmp.lt.s32.totalorder (!%p297_p0), %s1223_s17, 1  ;;  %vm356_vm0 = vcmask (!%p297_p0), 253952   ;;  %s1252_s25 = sshll.u32 (!%p297_p0), %s1223_s17, 7  ;;  %v428_v0 = vld [vmem:[%s1503_s4] sm:$0xff] (!%p297_p0)  ;;  %v1139_v1 = vmov (!%p297_p0), 0.0   ;;  %v1140_v2 = vmov (!%p297_p0), 0.0|0.0  }
  0x20   : > { %300 = sbr.rel (%p297_p0) target bundleno = 970 (0x3ca), region = 48  ;;  %357 = vst.msk [vmem:[#allocation3] sm:$0x1] (!%p297_p0), %vm356_vm0, %v1139_v1  ;;  %s359_s28 = sld [smem:[#allocation5 + %s1252_s25]] (!%p297_p0)  ;;  %927 = vmatprep.subr.bf16.mxu0 (!%p297_p0), %v1140_v2  ;;  %v429_v3 = vld [vmem:[%s1503_s4 + $0x8] sm:$0xff] (!%p297_p0)  ;;  %v430_v4 = vld [vmem:[%s1503_s4 + $0x10] sm:$0xff] (!%p297_p0)  ;;  %951 = vmatprep.subr.bf16.mxu1 (!%p297_p0), %v1140_v2 }
  0x21   : > { %s364_s29 = sadd.s32 (!%p297_p0), 1, %s1252_s25  ;;  %v431_v5 = vld [vmem:[%s1503_s4 + $0x18] sm:$0xff] (!%p297_p0)  ;;  %v928_v6 = vpack.c.bf16 (!%p297_p0), %v429_v3, %v428_v0  ;;  %s370_s21 = sadd.s32 (!%p297_p0), 2, %s1252_s25  ;;  %v432_v8 = vld [vmem:[%s1503_s4 + $0x20] sm:$0xff] (!%p297_p0)  ;;  %v433_v9 = vld [vmem:[%s1503_s4 + $0x28] sm:$0xff] (!%p297_p0)  ;;  %vm1141_vm1 = vmmov (!%p297_p0), 0  }
  0x22   : > { %s365_s20 = sld [smem:[#allocation5 + %s364_s29]] (!%p297_p0)  ;;  %v931_v7 = vpack.c.bf16 (!%p297_p0), %v431_v5, %v430_v4  ;;  %s376_s12 = sadd.s32 (!%p297_p0), 3, %s1252_s25  ;;  %v934_v11 = vpack.c.bf16 (!%p297_p0), %v433_v9, %v432_v8  ;;  %v434_v12 = vld [vmem:[%s1503_s4 + $0x30] sm:$0xff] (!%p297_p0)  ;;  %v435_v13 = vld [vmem:[%s1503_s4 + $0x38] sm:$0xff] (!%p297_p0)  ;;  %v436_v18 = vld [vmem:[%s1503_s4 + $0x40] sm:$0xff] (!%p297_p0)  ;;  %913 = vmatprep.mubr.msk.f32.mxu0 (!%p297_p0), %vm1141_vm1, %v1139_v1  ;;  %924 = vmatprep.mubr.msk.f32.mxu1 (!%p297_p0), %vm1141_vm1, %v1139_v1  ;;  %vm421_vm2 = vcmask (!%p297_p0), 261120   ;;  %v619_v8 = vlaneseq (!%p297_p0) }
  0x23   : > { %s1279_s27 = sld [smem:[#allocation5 + %s370_s21]] (!%p297_p0)  ;;  %929 = vmatpush3.bf16.msra.mxu0 (!%p297_p0), %v928_v6  ;;  %s382_s15 = sadd.s32 (!%p297_p0), 4, %s1252_s25  ;;  %v937_v16 = vpack.c.bf16 (!%p297_p0), %v435_v13, %v434_v12  ;;  %v437_v19 = vld [vmem:[%s1503_s4 + $0x48] sm:$0xff] (!%p297_p0)  ;;  %v438_v24 = vld [vmem:[%s1503_s4 + $0x50] sm:$0xff] (!%p297_p0)  ;;  %v439_v25 = vld [vmem:[%s1503_s4 + $0x58] sm:$0xff] (!%p297_p0)  ;;  %vm423_vm3 = vcmask (!%p297_p0), 523264  }
  0x24   : > { %s1515_s1 = sld [smem:[#allocation15_spill]] (!%p297_p0)  ;;  %930 = vmatprep.subr.bf16.mxu0 (!%p297_p0), %v1140_v2  ;;  %s388_s10 = sadd.s32 (!%p297_p0), 5, %s1252_s25  ;;  %v940_v22 = vpack.c.bf16 (!%p297_p0), %v437_v19, %v436_v18  ;;  %v524_v27 = vld [vmem:[%s1505_s6] sm:$0xff] (!%p297_p0)  ;;  %v525_v28 = vld [vmem:[%s1505_s6 + $0x8] sm:$0xff] (!%p297_p0)  ;;  %v943_v29 = vpack.c.bf16 (!%p297_p0), %v439_v25, %v438_v24  ;;  %v442_v35 = vld [vmem:[%s1503_s4 + $0x70] sm:$0xff] (!%p297_p0)  ;;  %vm425_vm4 = vcmask (!%p297_p0), 785408  }
  0x25   : > { %s1294_s21 = sld [smem:[#allocation5 + %s376_s12]] (!%p297_p0)  ;;  %v952_v30 = vpack.c.bf16 (!%p297_p0), %v525_v28, %v524_v27  ;;  %v440_v31 = vld [vmem:[%s1503_s4 + $0x60] sm:$0xff] (!%p297_p0)  ;;  %v441_v32 = vld [vmem:[%s1503_s4 + $0x68] sm:$0xff] (!%p297_p0)  ;;  %v443_v36 = vld [vmem:[%s1503_s4 + $0x78] sm:$0xff] (!%p297_p0)  ;;  %v1145_v50 = vmov (!%p297_p0), 0   ;;  %vm652_vm7 = vcmask (!%p297_p0), 7168  }
  0x26   : > { %s1298_s30 = sld [smem:[#allocation5 + %s382_s15]] (!%p297_p0)  ;;  %v946_v33 = vpack.c.bf16 (!%p297_p0), %v441_v32, %v440_v31  ;;  %v949_v40 = vpack.c.bf16 (!%p297_p0), %v443_v36, %v442_v35  ;;  %v526_v47 = vld [vmem:[%s1505_s6 + $0x10] sm:$0xff] (!%p297_p0)  ;;  %v527_v48 = vld [vmem:[%s1505_s6 + $0x18] sm:$0xff] (!%p297_p0)  ;;  %1016 = vset.pattern.permute.xlu1 (!%p297_p0), %v1145_v50  ;;  %1017 = vset.pattern.permute.xlu0 (!%p297_p0), %v1145_v50  ;;  %v846_v53 = vld [vmem:[%s1504_s5] ss:$0 sm:$0xff] (!%p297_p0)  ;;  %v1418_v9 = vand.u32 (!%p297_p0), 127, %v619_v8 }
  0x27   : > { %s1522_s17 = smov (!%p343_p1, %s1223_s17), 1  ;;  %932 = vmatpush3.bf16.msra.mxu0 %v931_v7  ;;  %s1304_s13 = sld [smem:[#allocation5 + %s388_s10]]  ;;  %953 = vmatpush3.bf16.msra.mxu1 %v952_v30  ;;  %v955_v49 = vpack.c.bf16 %v527_v48, %v526_v47  ;;  %v847_v60 = vld [vmem:[%s1506_s7] ss:$0 sm:$0xff] }
  0x28   : > { %s858_s26 = sshll.u32 %s1522_s17, 4  ;;  %933 = vmatprep.subr.bf16.mxu0 %v1140_v2  ;;  %954 = vmatprep.subr.bf16.mxu1 %v1140_v2  ;;  %s843_s12 = sshll.u32 %s1522_s17, 3  ;;  %vm621_vm8 = vcmp.lt.s32.totalorder %v1418_v9, 16 }
  0x29   : > { %s351_s29 = scalar_lea.vmem %s1501_s2, %s843_s12 }
  0x2a   : > { %s1284_s11 = scalar_lea.vmem %s1515_s1, %s858_s26  ;;  %s394_s1 = sadd.s32 6, %s1252_s25  ;;  %v615_v51 = vld [vmem:[%s351_s29] sm:$0xff] }
  0x2b   : > { %s360_s26 = scalar_lea.vmem %s1284_s11, %s359_s28  ;;  %s366_s22 = scalar_lea.vmem %s1284_s11, %s365_s20  ;;  %935 = vmatpush3.bf16.msra.mxu0 %v934_v11  ;;  %956 = vmatpush3.bf16.msra.mxu1 %v955_v49  ;;  %vm616_vm5 = vcmp.gt.f32.partialorder %v615_v51, 0.0 }
  0x2c   : > { %v361_v10 = vld [vmem:[%s360_s26] sm:$0x1]  ;;  %s372_s18 = scalar_lea.vmem %s1284_s11, %s1279_s27  ;;  %s395_s26 = sld [smem:[#allocation5 + %s394_s1]]  ;;  %936 = vmatprep.subr.bf16.mxu0 %v1140_v2  ;;  %v850_v52 = vsel %vm616_vm5, 1.0, %v1139_v1 }
  0x2d   : > { %363 = vst.msk [vmem:[#allocation3 + $0x1] sm:$0x1] %vm356_vm0, %v361_v10  ;;  %362 = vst.msk [vmem:[#allocation2] sm:$0x1] %vm356_vm0, %v361_v10  ;;  %v367_v14 = vld [vmem:[%s366_s22] sm:$0x1]  ;;  %s378_s10 = scalar_lea.vmem %s1284_s11, %s1294_s21  ;;  %s384_s1 = scalar_lea.vmem %s1284_s11, %s1298_s30 }
  0x2e   : > { %368 = vst.msk [vmem:[#allocation2 + $0x1] sm:$0x1] %vm356_vm0, %v367_v14  ;;  %369 = vst.msk [vmem:[#allocation3 + $0x2] sm:$0x1] %vm356_vm0, %v367_v14  ;;  %v373_v15 = vld [vmem:[%s372_s18] sm:$0x1]  ;;  %s390_s21 = scalar_lea.vmem %s1284_s11, %s1304_s13 }
  0x2f   : > { %s400_s20 = sadd.s32 7, %s1252_s25  ;;  %374 = vst.msk [vmem:[#allocation2 + $0x2] sm:$0x1] %vm356_vm0, %v373_v15  ;;  %375 = vst.msk [vmem:[#allocation3 + $0x3] sm:$0x1] %vm356_vm0, %v373_v15  ;;  %938 = vmatpush3.bf16.msra.mxu0 %v937_v16  ;;  %v653_v59 = vsel %vm652_vm7, %v850_v52, 0.0 }
  0x30   : > { %s1323_s28 = sld [smem:[#allocation5 + %s400_s20]]  ;;  %v379_v17 = vld [vmem:[%s378_s10] sm:$0x1]  ;;  %939 = vmatprep.subr.bf16.mxu0 %v1140_v2  ;;  %s1142_s20 = smov 32   ;;  %v851_v16 = vsel %vm621_vm8, 1.0, %v1139_v1 }
  0x31   : > { %380 = vst.msk [vmem:[#allocation2 + $0x3] sm:$0x1] %vm356_vm0, %v379_v17  ;;  %381 = vst.msk [vmem:[#allocation3 + $0x4] sm:$0x1] %vm356_vm0, %v379_v17  ;;  %v385_v20 = vld [vmem:[%s384_s1] sm:$0x1] }
  0x32   : > { %386 = vst.msk [vmem:[#allocation2 + $0x4] sm:$0x1] %vm356_vm0, %v385_v20  ;;  %387 = vst.msk [vmem:[#allocation3 + $0x5] sm:$0x1] %vm356_vm0, %v385_v20  ;;  %v391_v21 = vld [vmem:[%s390_s21] sm:$0x1]  ;;  %s396_s30 = scalar_lea.vmem %s1284_s11, %s395_s26 }
  0x33   : > { %392 = vst.msk [vmem:[#allocation2 + $0x5] sm:$0x1] %vm356_vm0, %v391_v21  ;;  %393 = vst.msk [vmem:[#allocation3 + $0x6] sm:$0x1] %vm356_vm0, %v391_v21  ;;  %v397_v23 = vld [vmem:[%s396_s30] sm:$0x1]  ;;  %941 = vmatpush3.bf16.msra.mxu0 %v940_v22 }
  0x34   : > { %398 = vst.msk [vmem:[#allocation2 + $0x6] sm:$0x1] %vm356_vm0, %v397_v23  ;;  %399 = vst.msk [vmem:[#allocation3 + $0x7] sm:$0x1] %vm356_vm0, %v397_v23  ;;  %942 = vmatprep.subr.bf16.mxu0 %v1140_v2  ;;  %s1143_s10 = smov 64   ;;  %s1380_s26 = sand.u32 1, %s1128_s0  }
  0x35   : > { %s839_s1 = sshll.u32 %s1380_s26, 3  ;;  %s681_s30 = scalar_lea.sflag [#allocation7], %s1380_s26 }
  0x36   : > { %s402_s13 = scalar_lea.vmem %s1284_s11, %s1323_s28  ;;  %s1386_s27 = scalar_lea.vmem [#allocation6], %s839_s1 }
  0x37   : > { %v403_v26 = vld [vmem:[%s402_s13] sm:$0x1]  ;;  %944 = vmatpush3.bf16.msra.mxu0 %v943_v29  ;;  %s1144_s13 = smov 96   ;;  %s355_s28 = scalar_lea.vmem %s1502_s3, %s843_s12 }
  0x38   : > { %404 = vst.msk [vmem:[#allocation2 + $0x7] sm:$0x1] %vm356_vm0, %v403_v26  ;;  %945 = vmatprep.subr.bf16.mxu0 %v1140_v2  ;;  %v614_v10 = vld [vmem:[%s355_s28] sm:$0xff]  ;;  %s1426_s12 = scalar_lea.hbm %s1507_s8, %s1252_s25  ;;  %s699_s21 = sshll.u32 %s1386_s27, 4  ;;  %s700_s21 = int_to_ptr.vmem [resolvable:$true] %s699_s21 }
  0x39   : > { %v635_v12 = vsub.f32 1.0, %v614_v10  ;;  %s1040_s29 = scalar_lea.vmem %s700_s21, 128  ;;  %s1146_s18 = smov [#allocation6]  }
  0x3a   : > { %p1041_p2 = scmp.ne.s32.totalorder %s700_s21, %s1040_s29 }
  0x3b   : > { %v406_v34 = vld [vmem:[#allocation3] sm:$0xff]  ;;  %947 = vmatpush3.bf16.msra.mxu0 %v946_v33 }
  0x3c   : > { %410 = vrot.lane.b32.xlu0 %v406_v34, %s1142_s20  ;;  %948 = vmatprep.subr.bf16.mxu0 %v1140_v2  ;;  %p1042_p3 = pnand %p1041_p2, %p1240_p10  ;;  %s1044_s20 = sshll.u32 %s1146_s18, 4  ;;  %s1045_s20 = int_to_ptr.vmem [resolvable:$false] %s1044_s20 }
  0x3d   : > { %p1047_p5 = scmp.lt.s32.totalorder %s700_s21, %s1045_s20 }
  0x3e   : > { %p1043_p4 = pneg %p1042_p3 }
  0x3f   : > { %v405_v37 = vld [vmem:[#allocation2] sm:$0xff]  ;;  %950 = vmatpush3.bf16.msra.mxu0 %v949_v40 }
  0x40   : > { %v407_v38 = vsub.f32 %v405_v37, %v406_v34  ;;  %v408_v39 = vmul.f32 %v406_v34, %v405_v37 }
  0x42   : > { %414 = vrot.lane.b32.xlu0 %v407_v38, %s1143_s10  ;;  %418 = vrot.lane.b32.xlu1 %v408_v39, %s1144_s13  ;;  %s1046_s10 = scalar_lea.vmem %s1045_s20, 256 }
  0x43   : > { %p1048_p6 = scmp.lt.s32.totalorder %s1046_s10, %s1040_s29 }
  0x45   : > { %p1049_p7 = por %p1048_p6, %p1047_p5 }
  0x46   : > { %626 = vperm.xlu1 %1016, %v850_v52  }
  0x47   : > { %p1050_p8 = pnand %p1049_p7, %p1043_p4 }
  0x6a   : > { %654 = vadd.xlane.f32.xlu1 %v653_v59 }
  0xae   : > { %v411_v41 = vpop.permute.xlu0 %410 }
  0xaf   : > { %v422_v42 = vsel %vm421_vm2, %v405_v37, %v411_v41 }
  0xb4   : > { %v415_v43 = vpop.permute.xlu0 %414  ;;  %v419_v44 = vpop.permute.xlu1 %418 }
  0xb5   : > { %v424_v45 = vsel %vm423_vm3, %v422_v42, %v415_v43 }
  0xb6   : > { %v426_v46 = vsel %vm425_vm4, %v424_v45, %v419_v44 }
  0xb7   : > { %427 = vst [vmem:[%s1386_s27] sm:$0xff] %v426_v46  ;;  %914 = vmatmul.mubr.f32.vlgmr.msra.gmra.mrb[0].mxu0 %v426_v46 }
  0xc5   : > { %v627_v17 = vpop.permute.xlu1 %626 }
  0xc6   : > { %v629_v20 = vmul.f32 %v851_v16, %v627_v17 }
  0xf7   : > { %v655_v24 = vpop.xlane.xlu1 %654 }
  0xf8   : > { %v656_v25 = vrot.slane %v655_v24, 4 }
  0xfa   : > { %v657_v26 = vadd.f32 %v656_v25, %v655_v24 }
  0xfc   : > { %v658_v27 = vrot.slane %v657_v26, 2 }
  0xfe   : > { %v659_v1 = vadd.f32 %v658_v27, %v657_v26 }
 0x100   : > { %v660_v33 = vrot.slane %v659_v1, 1 }
 0x18a   : > { %v517_v54 = vpop.f32.mrb[0].mxu0 }
 0x18b   : > { %v518_v55 = vadd.f32 %v846_v53, %v517_v54  ;;  %v915_v56 = vpop.f32.mrb[1].mxu0 }
 0x18d   : > { %vm521_vm6 = vcmp.gt.f32.partialorder %v518_v55, 0.0  ;;  %v522_v57 = vmul.f32 0.2, %v518_v55 }
 0x18f   : > { %v523_v58 = vsel %vm521_vm6, %v518_v55, %v522_v57 }
 0x190   : > { %925 = vmatmul.mubr.msk.f32.vlgmr.msra.gmra.mrb[0].mxu1 %vm421_vm2, %v523_v58 }
 0x263   : > { %v604_v61 = vpop.f32.mrb[0].mxu1 }
 0x264   : > { %v605_v62 = vadd.f32 %v847_v60, %v604_v61  ;;  %v926_v63 = vpop.f32.mrb[1].mxu1 }
 0x266   : > { %v849_v0 = vmul.f32 -1.442695, %v605_v62 }
 0x268   : > { %1018 = vpow2.f32 %v849_v0 }
 0x272   : > { %v1019_v2 = vpop.eup %1018 }
 0x273   : > { %v611_v3 = vadd.f32 1.0, %v1019_v2 }
 0x275   : > { %1020 = vrcp.f32 %v611_v3 }
 0x27f   : > { %v1409_v4 = vpop.eup %1020 }
 0x280   : > { %v630_v5 = vmax.f32 %v1409_v4, 0.0001 }
 0x282   : > { %v631_v6 = vmin.f32 %v630_v5, 0.9999 }
 0x284   : > { %1022 = vlog2.f32 %v631_v6  ;;  %v636_v7 = vsub.f32 1.0, %v631_v6 }
 0x286   : > { %1024 = vlog2.f32 %v636_v7 }
 0x28e   : > { %v1023_v11 = vpop.eup %1022 }
 0x28f   : > { %v633_v13 = vmul.f32 0.6931472, %v1023_v11 }
 0x290   : > { %v1025_v14 = vpop.eup %1024 }
 0x291   : > { %v638_v15 = vmul.f32 0.6931472, %v1025_v14  ;;  %v634_v18 = vmul.f32 %v633_v13, %v614_v10 }
 0x293   : > { %v639_v19 = vmul.f32 %v638_v15, %v635_v12 }
 0x295   : > { %v640_v21 = vadd.f32 %v639_v19, %v634_v18 }
 0x297   : > { %v641_v22 = vsub.f32 0.0, %v640_v21 }
 0x299   : > { %v642_v23 = vmul.f32 %v641_v22, %v629_v20 }
 0x29b   : > { %643 = vadd.xlane.f32.xlu0 %v642_v23 }
 0x328   : > { %v644_v28 = vpop.xlane.xlu0 %643 }
 0x329   : > { %v645_v29 = vrot.slane %v644_v28, 4 }
 0x32b   : > { %v646_v30 = vadd.f32 %v645_v29, %v644_v28 }
 0x32d   : > { %v647_v31 = vrot.slane %v646_v30, 2 }
 0x32f   : > { %v648_v32 = vadd.f32 %v647_v31, %v646_v30 }
 0x331   : > { %v649_v34 = vrot.slane %v648_v32, 1 }
 0x332   : > { %1053 = shalt.err (!%p1050_p8)
}
 0x333   : > { %s1054_s27 = scalar_lea.hbm %s1426_s12, 128  ;;  %s1058_s11 = scalar_lea.hbm %s1507_s8, 256 }
 0x334   : > { %p1055_p9 = scmp.ne.s32.totalorder %s1426_s12, %s1054_s27  ;;  %p1059_p0 = scmp.lt.u32.totalorder %s1426_s12, %s1507_s8 }
 0x335   : > { %p1060_p1 = scmp.lt.u32.totalorder %s1058_s11, %s1054_s27  ;;  %p1062_p3 = scmp.lt.u32.totalorder %s1054_s27, %s1426_s12 }
 0x336   : > { %p1056_p12 = pnand %p1055_p9, %p1240_p10 }
 0x337   : > { %p1061_p2 = por %p1060_p1, %p1059_p0 }
 0x338   : > { %p1057_p13 = pneg %p1056_p12 }
 0x339   : > { %p1063_p4 = por %p1062_p3, %p1061_p2 }
 0x33b   : > { %p1064_p5 = pnand %p1063_p4, %p1057_p13 }
 0x33d   : > { %1067 = shalt.err (!%p1064_p5)
}
 0x33e   : > { %963 = dma.vmem_to_hbm [thread:$0]  (%p1240_p10), %s700_s21, 128, %s1426_s12, %s681_s30   ;;  %v650_v35 = vadd.f32 %v649_v34, %v648_v32  ;;  %v661_v36 = vadd.f32 %v660_v33, %v659_v1  ;;  %v673_v39 = vshrl.u32 %v619_v8, 7  ;;  %vm675_vm9 = vcmp.eq.s32.totalorder %v1418_v9, 127 }
 0x33f   : > { %s1147_s20 = smov 1.0   ;;  %s342_s30 = scalar_lea.vmem [#allocation8], %s839_s1 }
 0x340   : > { %957 = vpush %v650_v35  ;;  %vm674_vm10 = vcmp.eq.s32.totalorder %v673_v39, 0  ;;  %s712_s13 = sshll.u32 %s342_s30, 4  ;;  %s1455_s28 = scalar_lea.hbm %s1508_s9, %s1252_s25  ;;  %s1457_s13 = int_to_ptr.vmem [resolvable:$true] %s712_s13 }
 0x341   : > { %959 = vpush %v661_v36  ;;  %vm676_vm11 = vmand %vm674_vm10, %vm675_vm9  ;;  %s686_s17 = scalar_lea.sflag [#allocation9], %s1380_s26  ;;  %s1148_s1 = smov [#allocation8]  }
 0x371   : > { %s958_s15 = spop %957 }
 0x372   : > { %s960_s29 = spop %959 }
 0x373   : > { %s663_s18 = smul.f32 16.0, %s960_s29  ;;  %s1072_s29 = sshll.u32 %s1148_s1, 4  ;;  %s1073_s29 = int_to_ptr.vmem [resolvable:$false] %s1072_s29 }
 0x374   : > { %p1075_p12 = scmp.lt.s32.totalorder %s1457_s13, %s1073_s29 }
 0x375   : > { %s665_s10 = smax.f32 %s1147_s20, %s663_s18  ;;  %p664_p6 = scmp.gt.f32.partialorder %s663_s18, 0.0 }
 0x376   : > { %v666_v37 = vstv %s665_s10  ;;  %s1074_s18 = scalar_lea.vmem %s1073_s29, 256 }
 0x377   : > { %1026 = vrcp.f32 %v666_v37 }
 0x381   : > { %v1027_v38 = vpop.eup %1026 }
 0x382   : > { %961 = vpush %v1027_v38 }
 0x3b3   : > { %s962_s27 = spop %961 }
 0x3b4   : > { %s669_s12 = smul.f32 %s962_s27, %s958_s15  ;;  %s1068_s15 = scalar_lea.vmem %s1457_s13, 128 }
 0x3b5   : > { %p1069_p7 = scmp.ne.s32.totalorder %s1457_s13, %s1068_s15  ;;  %p1076_p13 = scmp.lt.s32.totalorder %s1074_s18, %s1068_s15 }
 0x3b6   : > { %s670_s21 = smul.f32 4.0, %s669_s12 }
 0x3b7   : > { %p1070_p8 = pnand %p1069_p7, %p1240_p10  ;;  %p1077_p0 = por %p1076_p13, %p1075_p12 }
 0x3b8   : > { %s1524_s21 = smov (!%p664_p6, %s670_s21), 0.0 }
 0x3b9   : > { %v677_v40 = vstv %s1524_s21  ;;  %p1071_p9 = pneg %p1070_p8 }
 0x3ba   : > { %v678_v41 = vsel %vm676_vm11, %v677_v40, %v1409_v4 }
 0x3bb   : > { %679 = vst [vmem:[%s342_s30] sm:$0xff] %v678_v41  ;;  %p1078_p1 = pnand %p1077_p0, %p1071_p9 }
 0x3bd   : > { %1081 = shalt.err (!%p1078_p1)
}
 0x3be   : > { %s1082_s25 = scalar_lea.hbm %s1455_s28, 128  ;;  %s1086_s10 = scalar_lea.hbm %s1508_s9, 256 }
 0x3bf   : > { %p1083_p2 = scmp.ne.s32.totalorder %s1455_s28, %s1082_s25  ;;  %p1087_p5 = scmp.lt.u32.totalorder %s1455_s28, %s1508_s9 }
 0x3c0   : > { %p1088_p6 = scmp.lt.u32.totalorder %s1086_s10, %s1082_s25  ;;  %p1090_p8 = scmp.lt.u32.totalorder %s1082_s25, %s1455_s28 }
 0x3c1   : > { %p1084_p3 = pnand %p1083_p2, %p1240_p10 }
 0x3c2   : > { %p1089_p7 = por %p1088_p6, %p1087_p5 }
 0x3c3   : > { %p1085_p4 = pneg %p1084_p3 }
 0x3c4   : > { %p1091_p9 = por %p1090_p8, %p1089_p7 }
 0x3c6   : > { %p1092_p12 = pnand %p1091_p9, %p1085_p4 }
 0x3c8   : > { %1095 = shalt.err (!%p1092_p12)
}
 0x3c9   : > { %964 = dma.vmem_to_hbm [thread:$0]  (%p1240_p10), %s1457_s13, 128, %s1455_s28, %s686_s17  }
 0x3ca PF: > { %p974_p13 = scmp.ge.s32.totalorder %s1136_s16, 2  ;;  %s724_s21 = sand.u32 1, %s1124_s14  }
 0x3cb   : > { %s725_s30 = scalar_lea.sflag [#allocation7], %s724_s21 }
 0x3cc   : > { %p968_p0 = pnand %p974_p13, %p1244_p11 }
 0x3ce   : > { %1115 = dma.done.wait (!%p968_p0), %s725_s30, 128  }
 0x3cf   : > { %1117 = vsyncadd (!%p968_p0), %s725_s30, 4294967168  ;;  %s734_s22 = scalar_lea.sflag [#allocation9], %s724_s21 }
 0x3d0   : > { %1119 = dma.done.wait (!%p968_p0), %s734_s22, 128  }
 0x3d1   : > { %1121 = vsyncadd (!%p968_p0), %s734_s22, 4294967168  ;;  %s1516_s23 = sld [smem:[#allocation13_spill]]  ;;  %s1517_s15 = sld [smem:[#allocation14_spill]] }
 0x3d2   : > { %p29_p10 = scmp.ge.s32.totalorder %s1227_s19, 4   ;;  %s1518_s14 = smov %s1128_s0 }
 0x3d3   : > { %s1520_s16 = smov %s1227_s19 }
 0x3d4   :  { %31 = sbr.rel (!%p29_p10) target bundleno = 20 (0x14), region = 114 }
 0x3d7   : > { %s1519_s0 = smov %s1516_s23 }
 0x3db   :  { %739 = vsyncpa [#allocation7], 1 }
 0x3dc   :  { %741 = vsyncpa [#allocation7 + $0x1], 1 }
 0x3dd   :  { %742 = vsyncpa [#allocation9], 1 }
 0x3de   :  { %744 = vsyncpa [#allocation9 + $0x1], 1 }

</bundles_post_ra>
